<compile_context>
chip_gen: v6e
topology: v6e:2x2x1
jax: 0.10.0
libtpu: 0.0.40
codegen_flags: <defaults>
</compile_context>

<pallas_src>
import functools
import math

import jax
import jax.numpy as jnp
from jax.experimental import pallas as pl
from jax.experimental.pallas import tpu as pltpu


def _round_up(v, m):
    return ((v + m - 1) // m) * m


def _pad2d(x, rows, cols):
    pr, pc = rows - x.shape[0], cols - x.shape[1]
    if pr or pc:
        x = jnp.pad(x, ((0, pr), (0, pc)))
    return x


def _vmem_budget_bytes():
    """~75% of this generation's physical VMEM (v5e/v6e: 128 MiB, v7x: 64 MiB)."""
    try:
        cap = int(pltpu.get_tpu_info().vmem_capacity_bytes)
    except Exception:
        cap = 64 * 2 ** 20
    return int(min(max((cap * 3) // 4, 32 * 2 ** 20), 96 * 2 ** 20))


# ---------------------------------------------------------------------------
# Kernel 1: d^{-1/2} of the self-loop-augmented degrees (one pass over bf16 adj)
# ---------------------------------------------------------------------------
def dinv_sqrt_kernel(adj_ref, o_ref, acc_ref):
    k = pl.program_id(1)

    @pl.when(k == 0)
    def _init():
        acc_ref[...] = jnp.zeros_like(acc_ref)

    # bf16 adjacency tile -> f32 row-sum (exact: entries are 0/1)
    acc_ref[...] += jnp.sum(adj_ref[...].astype(jnp.float32),
                            axis=1, keepdims=True)

    @pl.when(k == pl.num_programs(1) - 1)
    def _finalize():
        # degree of (A + I) = rowsum(A) + 1  (always > 0, rsqrt is safe)
        o_ref[...] = jax.lax.rsqrt(acc_ref[...] + 1.0)


def compute_dinv_sqrt(adj, tm, tk, vmem_limit):
    n_pad = adj.shape[0]
    grid = (n_pad // tm, n_pad // tk)
    return pl.pallas_call(
        dinv_sqrt_kernel,
        out_shape=jax.ShapeDtypeStruct((n_pad, 1), jnp.float32),
        grid_spec=pltpu.PrefetchScalarGridSpec(
            num_scalar_prefetch=0,
            grid=grid,
            in_specs=[pl.BlockSpec((tm, tk), lambda i, k: (i, k))],
            out_specs=pl.BlockSpec((tm, 1), lambda i, k: (i, 0)),
            scratch_shapes=[pltpu.VMEM((tm, 1), jnp.float32)],
        ),
        compiler_params=pltpu.CompilerParams(
            dimension_semantics=("parallel", "arbitrary"),
            vmem_limit_bytes=vmem_limit),
        cost_estimate=pl.CostEstimate(
            flops=int(n_pad) * int(n_pad),
            transcendentals=int(n_pad),
            bytes_accessed=int(adj.size) * 2 + int(n_pad) * 4),
    )(adj)


# ---------------------------------------------------------------------------
# Kernel 2: z = D^-1/2 * x  (column scale folded into the features, bf16)
# ---------------------------------------------------------------------------
def prescale_kernel(dinv_ref, x_ref, o_ref):
    o_ref[...] = (dinv_ref[...] * x_ref[...]).astype(o_ref.dtype)


def prescale_features(dinv, x, tm, vmem_limit):
    n_pad, d = x.shape
    return pl.pallas_call(
        prescale_kernel,
        out_shape=jax.ShapeDtypeStruct((n_pad, d), jnp.bfloat16),
        grid_spec=pltpu.PrefetchScalarGridSpec(
            num_scalar_prefetch=0,
            grid=(n_pad // tm,),
            in_specs=[pl.BlockSpec((tm, 1), lambda i: (i, 0)),
                      pl.BlockSpec((tm, d), lambda i: (i, 0))],
            out_specs=pl.BlockSpec((tm, d), lambda i: (i, 0)),
        ),
        compiler_params=pltpu.CompilerParams(
            dimension_semantics=("parallel",), vmem_limit_bytes=vmem_limit),
    )(dinv, x)


# ---------------------------------------------------------------------------
# Kernel 3: small row-tiled  z @ W  in bf16 (used when Dout_pad < Din_pad)
# ---------------------------------------------------------------------------
def feat_linear_kernel(x_ref, w_ref, o_ref):
    o_ref[...] = jnp.dot(x_ref[...], w_ref[...],
                         preferred_element_type=jnp.float32).astype(o_ref.dtype)


def feat_linear(z, w, tm, vmem_limit):
    n_pad, din_p = z.shape
    dout_p = w.shape[1]
    return pl.pallas_call(
        feat_linear_kernel,
        out_shape=jax.ShapeDtypeStruct((n_pad, dout_p), jnp.bfloat16),
        grid_spec=pltpu.PrefetchScalarGridSpec(
            num_scalar_prefetch=0,
            grid=(n_pad // tm,),
            in_specs=[pl.BlockSpec((tm, din_p), lambda i: (i, 0)),
                      pl.BlockSpec((din_p, dout_p), lambda i: (0, 0))],
            out_specs=pl.BlockSpec((tm, dout_p), lambda i: (i, 0)),
        ),
        compiler_params=pltpu.CompilerParams(
            dimension_semantics=("parallel",), vmem_limit_bytes=vmem_limit),
        cost_estimate=pl.CostEstimate(
            flops=2 * int(n_pad) * int(din_p) * int(dout_p),
            transcendentals=0,
            bytes_accessed=2 * int(z.size + w.size + n_pad * dout_p)),
    )(z, w)


# ---------------------------------------------------------------------------
# Kernel 4: fused GCN layer — streamed bf16 adjacency reduction with f32 acc;
#           finalize applies row scale + self-loop, bf16 weight matmul, ReLU,
#           residual, and emits f32 (h / final) and/or the next layer's bf16 z.
# ---------------------------------------------------------------------------
def gcn_layer_kernel(adj_ref, zk_ref, zi_ref, dinv_ref, *rest,
                     has_w, has_res, emit_out, emit_z):
    idx = 0
    w_ref = h_ref = None
    if has_w:
        w_ref = rest[idx]; idx += 1
    if has_res:
        h_ref = rest[idx]; idx += 1
    out_ref = z_next_ref = None
    if emit_out:
        out_ref = rest[idx]; idx += 1
    if emit_z:
        z_next_ref = rest[idx]; idx += 1
    acc_ref = rest[idx]

    k = pl.program_id(1)

    @pl.when(k == 0)
    def _init():
        acc_ref[...] = jnp.zeros_like(acc_ref)

    # --- streamed step: bf16 binary-adjacency tile feeds the MXU directly ----
    # (D^-1/2 column scale + ReLU are already folded into the streamed z tiles)
    acc_ref[...] += jnp.dot(adj_ref[...], zk_ref[...],
                            preferred_element_type=jnp.float32)

    # --- finalize: row scale, self-loop term, weight matmul, ReLU, residual ---
    @pl.when(k == pl.num_programs(1) - 1)
    def _finalize():
        dinv_i = dinv_ref[...]                                    # (tm, 1) f32
        # D^-1/2 (A z + z)  with  z = D^-1/2 x  ==  D^-1/2 (A + I) D^-1/2 x
        pre = dinv_i * (acc_ref[...] + zi_ref[...].astype(jnp.float32))
        if has_w:                                                 # fused x @ W^T
            pre = jnp.dot(pre.astype(jnp.bfloat16), w_ref[...],
                          preferred_element_type=jnp.float32)
        if emit_out:                          # pre-activation: h (ln=0) / final out
            out_ref[...] = pre.astype(out_ref.dtype)
        if emit_z:                            # next layer's pre-scaled bf16 operand
            act = jnp.maximum(pre, 0.0)
            if has_res:
                act = act + h_ref[...]
            z_next_ref[...] = (dinv_i * act).astype(z_next_ref.dtype)


def gcn_aggregate(adj, z, dinv, w, h, *, emit_out, emit_z, tm, tk, vmem_limit):
    n_pad = adj.shape[0]
    d_stream = z.shape[1]
    dout_p = w.shape[1] if w is not None else d_stream
    grid = (n_pad // tm, n_pad // tk)

    in_specs = [
        pl.BlockSpec((tm, tk), lambda i, k: (i, k)),         # streamed adjacency
        pl.BlockSpec((tk, d_stream), lambda i, k: (k, 0)),   # streamed z k-block
        pl.BlockSpec((tm, d_stream), lambda i, k: (i, 0)),   # z row block (self-loop)
        pl.BlockSpec((tm, 1), lambda i, k: (i, 0)),          # d^-1/2 row block
    ]
    args = [adj, z, z, dinv]
    if w is not None:
        in_specs.append(pl.BlockSpec((d_stream, dout_p), lambda i, k: (0, 0)))
        args.append(w)
    if h is not None:
        in_specs.append(pl.BlockSpec((tm, dout_p), lambda i, k: (i, 0)))
        args.append(h)

    out_shapes, out_specs = [], []
    if emit_out:
        out_shapes.append(jax.ShapeDtypeStruct((n_pad, dout_p), jnp.float32))
        out_specs.append(pl.BlockSpec((tm, dout_p), lambda i, k: (i, 0)))
    if emit_z:
        out_shapes.append(jax.ShapeDtypeStruct((n_pad, dout_p), jnp.bfloat16))
        out_specs.append(pl.BlockSpec((tm, dout_p), lambda i, k: (i, 0)))

    flops = 2 * n_pad * n_pad * d_stream
    if w is not None:
        flops += 2 * n_pad * d_stream * dout_p
    bytes_accessed = (2 * adj.size                              # bf16 adjacency
                      + 2 * z.size * (n_pad // tm)              # re-streamed z
                      + 2 * z.size + 4 * n_pad
                      + (2 * w.size if w is not None else 0)
                      + (4 * h.size if h is not None else 0)
                      + len(out_shapes) * 4 * n_pad * dout_p)

    kernel = functools.partial(gcn_layer_kernel, has_w=w is not None,
                               has_res=h is not None,
                               emit_out=emit_out, emit_z=emit_z)

    outs = pl.pallas_call(
        kernel,
        out_shape=tuple(out_shapes),
        grid_spec=pltpu.PrefetchScalarGridSpec(
            num_scalar_prefetch=0,
            grid=grid,
            in_specs=in_specs,
            out_specs=tuple(out_specs),
            scratch_shapes=[pltpu.VMEM((tm, d_stream), jnp.float32)],
        ),
        compiler_params=pltpu.CompilerParams(
            dimension_semantics=("parallel", "arbitrary"),
            vmem_limit_bytes=vmem_limit),
        cost_estimate=pl.CostEstimate(flops=int(flops), transcendentals=0,
                                      bytes_accessed=int(bytes_accessed)),
    )(*args)
    if not isinstance(outs, (tuple, list)):
        outs = (outs,)
    return outs


# ---------------------------------------------------------------------------
# Forward pass
# ---------------------------------------------------------------------------
def net_gcn_dense_forward(x, adj_binary, weights, use_res=True, *,
                          tile_m=512, tile_k=2048):
    """Pallas forward of net_gcn_dense.  `weights[ln]` is (in_dim, out_dim)
    (i.e. the PyTorch Linear weight, transposed; bias=False)."""
    # TODO(synk): BatchNorm1d (use_bn), Dropout (val_test=False) and the
    # spar_adj / spar_wei learned-mask branches are not implemented here.
    layer_num = len(weights)
    n = adj_binary.shape[0]
    d_final = weights[-1].shape[1]

    n128 = _round_up(n, 128)
    tm = min(tile_m, n128)
    tk = min(tile_k, n128)
    # NOTE: on v7x keep n_pad // tm >= 2 for real graphs (true for tm=512 once
    # N >= 1024) so the "parallel" row axis still shards across both TensorCores.
    n_pad = _round_up(n, math.lcm(tm, tk))
    vmem_limit = _vmem_budget_bytes()

    # The only O(N^2) HBM operand: binary adjacency, stored & streamed in bf16
    # (0/1 is exact in bf16).  Padded rows/cols are zero and sliced off at the end.
    adj_p = _pad2d(adj_binary, n_pad, n_pad).astype(jnp.bfloat16)

    # d^{-1/2} of (A + I): one pass over the bf16 adjacency, reused by all layers
    dinv = compute_dinv_sqrt(adj_p, tm, tk, vmem_limit)         # (n_pad, 1) f32

    # z = D^-1/2 x  (column scale folded into the features once, bf16)
    x_p = _pad2d(x.astype(jnp.float32), n_pad, _round_up(x.shape[1], 128))
    z = prescale_features(dinv, x_p, tm, vmem_limit)

    h = None
    out = None
    for ln in range(layer_num):
        w = weights[ln]
        din, dout = w.shape
        din_p, dout_p = _round_up(din, 128), _round_up(dout, 128)
        w_p = _pad2d(w.astype(jnp.float32), din_p, dout_p).astype(jnp.bfloat16)

        last = ln == layer_num - 1
        add_res = use_res and (ln >= 1) and (not last) and (h is not None)
        emit_out = last or (ln == 0 and use_res and layer_num >= 3)
        emit_z = not last
        res = h if add_res else None

        if dout_p < din_p:
            # cheaper association: (D^-1/2 x) @ W first, stream the narrow matrix
            zw = feat_linear(z, w_p, tm, vmem_limit)
            outs = gcn_aggregate(adj_p, zw, dinv, None, res,
                                 emit_out=emit_out, emit_z=emit_z,
                                 tm=tm, tk=tk, vmem_limit=vmem_limit)
        else:
            outs = gcn_aggregate(adj_p, z, dinv, w_p, res,
                                 emit_out=emit_out, emit_z=emit_z,
                                 tm=tm, tk=tk, vmem_limit=vmem_limit)
        idx = 0
        if emit_out:
            out = outs[idx]; idx += 1
        if emit_z:
            z = outs[idx]                 # next layer's bf16, D^-1/2-scaled input
        if ln == 0 and emit_out and not last:
            h = out                       # pre-ReLU layer-0 activations (f32)
    return out[:n, :d_final]


# ---------------------------------------------------------------------------
# Pure-JAX reference (mirrors the PyTorch forward, f32)
# ---------------------------------------------------------------------------
def reference_forward(x, adj_binary, weights, use_res=True):
    n = adj_binary.shape[0]
    a = adj_binary + jnp.eye(n, dtype=adj_binary.dtype)
    deg = a.sum(1)
    dis = jnp.where(deg > 0, 1.0 / jnp.sqrt(deg), 0.0)
    adj = a * dis[:, None] * dis[None, :]
    layer_num = len(weights)
    h = None
    for ln in range(layer_num):
        x = adj @ x
        x = x @ weights[ln]
        if ln == 0:
            h = x
        if ln == layer_num - 1:
            break
        x = jnp.maximum(x, 0.0)
        if ln and use_res:
            x = x + h
    return x


# ---------------------------------------------------------------------------
if __name__ == "__main__":
    key = jax.random.PRNGKey(0)

    num_nodes = 200                      # pads to 256 -> a real (2 x 2) tile grid
    embedding_dim = [192, 128, 128, 16]  # 3 layers: exercises residual, the
                                         # z@W-first path (192->128) and the
                                         # padded / lane-dense 16-wide output

    # deterministic edge_index: bidirectional ring + arithmetic chords
    idx = jnp.arange(num_nodes, dtype=jnp.int32)
    ring_dst = (idx + 1) % num_nodes
    chord_dst = (idx * 7 + 3) % num_nodes
    rows = jnp.concatenate([idx, ring_dst, idx, chord_dst])
    cols = jnp.concatenate([ring_dst, idx, chord_dst, idx])

    # to_dense_adj(edge_index)[0]
    adj_binary = jnp.zeros((num_nodes, num_nodes), jnp.float32)
    adj_binary = adj_binary.at[rows, cols].set(1.0)

    # node features
    key, kx = jax.random.split(key)
    x = jax.random.normal(kx, (num_nodes, embedding_dim[0]), jnp.float32)

    # Linear weights (bias=False): PyTorch stores (out, in); kernels get (in, out)
    weights = []
    for ln in range(len(embedding_dim) - 1):
        key, kw = jax.random.split(key)
        din, dout = embedding_dim[ln], embedding_dim[ln + 1]
        w_pt = jax.random.normal(kw, (dout, din), jnp.float32) / jnp.sqrt(din)
        weights.append(w_pt.T)            # (in, out)

    # small tiles so the tiny demo graph still exercises a multi-step grid;
    # real graphs use the tile_m=512 / tile_k=2048 defaults.
    out = net_gcn_dense_forward(x, adj_binary, weights, use_res=True,
                                tile_m=128, tile_k=128)
    out = jax.block_until_ready(out)

    ref = reference_forward(x, adj_binary, weights, use_res=True)
    assert out.shape == (num_nodes, embedding_dim[-1]), out.shape
    # bf16 MXU operands (f32 accumulation) -> relative-error check vs the f32 ref
    rel_err = float(jnp.max(jnp.abs(out - ref)) / (jnp.max(jnp.abs(ref)) + 1e-6))
    assert rel_err < 3e-2, f"mismatch vs reference: rel_err={rel_err}"

    print("KERNEL_OK")
</pallas_src>

<mosaic_0001>
module attributes {stable_mosaic.version = 11 : i64} {
  func.func @dinv_sqrt_kernel(%arg0: i32, %arg1: i32, %arg2: memref<128x128xbf16, #tpu.memory_space<vmem>>, %arg3: memref<128x1xf32, #tpu.memory_space<vmem>>, %arg4: memref<128x1xf32, #tpu.memory_space<vmem>>) attributes {dimension_semantics = [#tpu.dimension_semantics<parallel>, #tpu.dimension_semantics<arbitrary>], iteration_bounds = array<i64: 2, 2>, scalar_prefetch = 0 : i64, scratch_operands = 1 : i64, tpu.core_type = #tpu.core_type<tc>, window_params = [{transform_indices = @transform_0, window_bounds = array<i64: 128, 128>}, {transform_indices = @transform_1, window_bounds = array<i64: 128, 1>}]} {
    %c0_i32 = arith.constant 0 : i32
    %0 = arith.cmpi eq, %arg1, %c0_i32 : i32
    %1 = arith.extui %0 : i1 to i32
    %c0_i32_0 = arith.constant 0 : i32
    %2 = arith.cmpi ne, %1, %c0_i32_0 : i32
    scf.if %2 {
      %cst_7 = arith.constant 0.000000e+00 : f32
      %13 = vector.broadcast %cst_7 : f32 to vector<128x1xf32>
      %c0_8 = arith.constant 0 : index
      %c0_9 = arith.constant 0 : index
      %14 = vector.load %arg4[%c0_8, %c0_9] : memref<128x1xf32, #tpu.memory_space<vmem>>, vector<128x1xf32>
      tpu.vector_store %arg4[%c0_8, %c0_9], %13 {strides = array<i32>} : memref<128x1xf32, #tpu.memory_space<vmem>>, vector<128x1xf32>,
    } else {
    }
    %c0 = arith.constant 0 : index
    %c0_1 = arith.constant 0 : index
    %3 = vector.load %arg4[%c0, %c0_1] : memref<128x1xf32, #tpu.memory_space<vmem>>, vector<128x1xf32>
    %c0_2 = arith.constant 0 : index
    %c0_3 = arith.constant 0 : index
    %4 = vector.load %arg2[%c0_2, %c0_3] : memref<128x128xbf16, #tpu.memory_space<vmem>>, vector<128x128xbf16>
    %5 = arith.extf %4 : vector<128x128xbf16> to vector<128x128xf32>
    %cst = arith.constant dense<0.000000e+00> : vector<128xf32>
    %6 = vector.multi_reduction <add>, %5, %cst [1] : vector<128x128xf32> to vector<128xf32>
    %7 = vector.shape_cast %6 : vector<128xf32> to vector<128x1xf32>
    %8 = arith.addf %3, %7 : vector<128x1xf32>
    %c0_4 = arith.constant 0 : index
    %c0_5 = arith.constant 0 : index
    %9 = vector.load %arg4[%c0_4, %c0_5] : memref<128x1xf32, #tpu.memory_space<vmem>>, vector<128x1xf32>
    tpu.vector_store %arg4[%c0_4, %c0_5], %8 {strides = array<i32>} : memref<128x1xf32, #tpu.memory_space<vmem>>, vector<128x1xf32>,
    %c1_i32 = arith.constant 1 : i32
    %10 = arith.cmpi eq, %arg1, %c1_i32 : i32
    %11 = arith.extui %10 : i1 to i32
    %c0_i32_6 = arith.constant 0 : i32
    %12 = arith.cmpi ne, %11, %c0_i32_6 : i32
    scf.if %12 {
      %c0_7 = arith.constant 0 : index
      %c0_8 = arith.constant 0 : index
      %13 = vector.load %arg4[%c0_7, %c0_8] : memref<128x1xf32, #tpu.memory_space<vmem>>, vector<128x1xf32>
      %cst_9 = arith.constant 1.000000e+00 : f32
      %14 = vector.broadcast %cst_9 : f32 to vector<128x1xf32>
      %15 = arith.addf %13, %14 : vector<128x1xf32>
      %16 = math.rsqrt %15 : vector<128x1xf32>
      %c0_10 = arith.constant 0 : index
      %c0_11 = arith.constant 0 : index
      %17 = vector.load %arg3[%c0_10, %c0_11] : memref<128x1xf32, #tpu.memory_space<vmem>>, vector<128x1xf32>
      tpu.vector_store %arg3[%c0_10, %c0_11], %16 {strides = array<i32>} : memref<128x1xf32, #tpu.memory_space<vmem>>, vector<128x1xf32>,
    } else {
    }
    return
  }
  func.func @transform_0(%arg0: i32, %arg1: i32) -> (i32, i32) {
    %c0_i32 = arith.constant 0 : i32
    return %arg0, %arg1 : i32, i32
  }
  func.func @transform_1(%arg0: i32, %arg1: i32) -> (i32, i32) {
    %c0_i32 = arith.constant 0 : i32
    %c0_i32_0 = arith.constant 0 : i32
    return %arg0, %c0_i32 : i32, i32
  }
}

</mosaic_0001>

<bundles_post_ra>
// kernel: tpu_custom_call.1
= control target key start
LH: loop header
LB: loop body
LE: loop exit
PB: predicated region body
PF: predicated region fallthrough
CT: control target
= control target key end

     0   :  { %6 = vsyncpa [#allocation4], 0  ;;  %s912_s0 = inlined_call_operand.hbm [shape: bf16[256,256], index: 0, kind: input, shape index: {}]   ;;  %s913_s1 = inlined_call_operand.vmem [shape: f32[256,1], index: 1, kind: output, shape index: {}]  }
   0x1   :  { %8 = vsyncpa [#allocation4 + $0x1], 0  ;;  %s712_s6 = smov 0   ;;  %s714_s7 = smov 0  }
   0x2   :  { %s716_s8 = smov 0   ;;  %s718_s9 = smov 0  }
   0x3   :  { %s720_s10 = smov 0   ;;  %s722_s11 = smov 0  }
   0x4   :  { %s724_s12 = smov 0   ;;  %s726_s13 = smov 0  }
   0x5 LB: > { %s438_s14 = sadd.s32 4294967295, %s695_s13   ;;  %s23_s15 = sadd.s32 1, %s687_s11  ;;  %s695_s13 = sphi %s726_s13, %s14_s13   ;;  %s691_s12 = sphi %s724_s12, %s923_s12   ;;  %s687_s11 = sphi %s722_s11, %s922_s11   ;;  %s683_s10 = sphi %s720_s10, %s921_s10   ;;  %s679_s9 = sphi %s718_s9, %s920_s9   ;;  %s675_s8 = sphi %s716_s8, %s919_s8   ;;  %s671_s7 = sphi %s714_s7, %s918_s7   ;;  %s667_s6 = sphi %s712_s6, %s917_s6  }
   0x6   : > { %p24_p0 = scmp.ge.s32.totalorder %s23_s15, 2  ;;  %s26_s16 = sadd.s32 1, %s691_s12 }
   0x7   : > { %s35_s17 = sadd.s32 1, %s675_s8  ;;  %p42_p1 = scmp.ne.s32.totalorder %s675_s8, %s671_s7 }
   0x8   : > { %s925_s15 = smov (%p24_p0, %s23_s15), 0  ;;  %s927_s16 = smov (!%p24_p0, %s26_s16), %s691_s12 }
   0x9   : > { %s31_s18 = ssub.s32 %s687_s11, %s925_s15  ;;  %p43_p2 = scmp.eq.s32.totalorder %s695_s13, 0 }
   0xa   : > { %p28_p3 = scmp.ge.s32.totalorder %s927_s16, 2  ;;  %p48_p4 = scmp.ne.s32.totalorder %s671_s7, %s667_s6 }
   0xb   : > { %p763_p5 = por %p43_p2, %p42_p1  ;;  %p49_p6 = scmp.eq.s32.totalorder %s438_s14, 0 }
   0xc   : > { %s929_s16 = smov (%p28_p3, %s927_s16), 0  ;;  %p500_p8 = scmp.lt.s32.totalorder %s695_s13, 4 }
   0xd   : > { %p769_p7 = por %p49_p6, %p48_p4  ;;  %s30_s21 = ssub.s32 %s691_s12, %s929_s16 }
   0xe   : > { %s32_s22 = sor.u32 %s31_s18, %s30_s21  ;;  %s98_s23 = sand.u32 1, %s675_s8  }
   0xf   : > { %p33_p9 = scmp.eq.s32.totalorder %s32_s22, 0  ;;  %s442_s24 = sshll.u32 %s98_s23, 6 }
  0x10   : > { %s454_s25 = sshll.u32 %s691_s12, 5  ;;  %s102_s29 = scalar_lea.vmem [#allocation3], %s442_s24 }
  0x11   : > { %s779_s26 = scalar_select %p33_p9, %s675_s8, %s35_s17  }
  0x12   : > { %s108_s27 = sadd.s32 %s687_s11, %s454_s25  ;;  %s111_s30 = sshll.u32 %s102_s29, 4  ;;  %s112_s30 = int_to_ptr.vmem [resolvable:$true] %s111_s30 }
  0x13   : > { %s445_s28 = sshll.u32 %s108_s27, 6  ;;  %p789_p10 = pnand %p500_p8, %p763_p5 }
  0x14   : > { %s110_s4 = scalar_lea.hbm %s912_s0, %s445_s28  ;;  %p446_p11 = scmp.ge.s32.totalorder %s695_s13, 1 }
  0x15   : > { %s99_s6 = scalar_lea.sflag [#allocation4], %s98_s23  ;;  %p603_p12 = pneg %p789_p10 }
  0x16   : > { %s614_s14 = scalar_lea.vmem %s112_s30, 1024  ;;  %s697_s17 = smov [#allocation3]  }
  0x17   : > { %p615_p13 = scmp.ne.s32.totalorder %s112_s30, %s614_s14  ;;  %s619_s18 = sshll.u32 %s697_s17, 4  ;;  %s620_s18 = int_to_ptr.vmem [resolvable:$false] %s619_s18 }
  0x18   : > { %s621_s21 = scalar_lea.vmem %s620_s18, 2048  ;;  %p622_p2 = scmp.lt.s32.totalorder %s112_s30, %s620_s18 }
  0x19   : > { %p617_p0 = pnand %p615_p13, %p603_p12  ;;  %p623_p3 = scmp.lt.s32.totalorder %s621_s21, %s614_s14 }
  0x1b   : > { %p618_p1 = pneg %p617_p0  ;;  %p624_p4 = por %p623_p3, %p622_p2 }
  0x1d   : > { %p625_p5 = pnand %p624_p4, %p618_p1 }
  0x1f   : > { %628 = shalt.err (!%p625_p5)
}
  0x20   : > { %s698_s19 = smov 128   ;;  %s699_s22 = smov 64  }
  0x21   : > { %s700_s23 = smov 4   ;;  %p119_p6 = scmp.lt.s32.totalorder %s695_s13, 5 }
  0x22   : > { %499 = dma.hbm_to_vmem [thread:$0]  (!%p789_p10), %s110_s4, 1024, %s112_s30, %s99_s6, %s698_s19, %s699_s22, %s700_s23  }
  0x23   : > { %p120_p8 = pnand %p446_p11, %p119_p6 }
  0x24   : > { %s125_s24 = sand.u32 (!%p120_p8), 1, %s671_s7  }
  0x25   : > { %123 = sbr.rel (%p120_p8) target bundleno = 264 (0x108), region = 24  ;;  %s447_s25 = sshll.u32 (!%p120_p8), %s125_s24, 6 }
  0x26   : > { %s126_s27 = scalar_lea.sflag (!%p120_p8), [#allocation4], %s125_s24  ;;  %s802_s28 = scalar_lea.vmem (!%p120_p8), [#allocation3], %s447_s25 }
  0x2a   : > { %662 = dma.done.wait (%p769_p7), %s126_s27, 1024  }
  0x2b   : > { %664 = vsyncadd (%p769_p7), %s126_s27, 4294966272  ;;  %s448_s29 = sshll.u32 %s683_s10, 4  ;;  %p450_p10 = scmp.ne.s32.totalorder %s679_s9, 0 }
  0x2c   : > { %p150_p9 = scmp.lt.s32.totalorder %s448_s29, 31 }
  0x2d   : > { %158 = sbr.rel (%p450_p10) target bundleno = 59 (0x3b), region = 32 }
  0x2e   : > { %s931_s29 = smov (!%p150_p9, %s448_s29), 31 }
  0x2f   : > { %s449_s30 = sshll.u32 %s931_s29, 3 }
  0x30   : > { %s812_s4 = scalar_lea.vmem %s913_s1, %s449_s30 }
  0x32   : > { %vm159_vm0 = vcmask 7168   ;;  %v701_v0 = vmov 0.0  }
  0x33   : > { %160 = vst.msk [vmem:[#allocation2] sm:$0xff] %vm159_vm0, %v701_v0  ;;  %161 = vst.msk [vmem:[#allocation2 + $0x8] sm:$0xff] %vm159_vm0, %v701_v0 }
  0x34   : > { %162 = vst.msk [vmem:[#allocation2 + $0x10] sm:$0xff] %vm159_vm0, %v701_v0  ;;  %163 = vst.msk [vmem:[#allocation2 + $0x18] sm:$0xff] %vm159_vm0, %v701_v0 }
  0x35   : > { %164 = vst.msk [vmem:[#allocation2 + $0x20] sm:$0xff] %vm159_vm0, %v701_v0  ;;  %165 = vst.msk [vmem:[#allocation2 + $0x28] sm:$0xff] %vm159_vm0, %v701_v0 }
  0x36   : > { %166 = vst.msk [vmem:[#allocation2 + $0x30] sm:$0xff] %vm159_vm0, %v701_v0  ;;  %167 = vst.msk [vmem:[#allocation2 + $0x38] sm:$0xff] %vm159_vm0, %v701_v0 }
  0x37   : > { %168 = vst.msk [vmem:[#allocation2 + $0x40] sm:$0xff] %vm159_vm0, %v701_v0  ;;  %169 = vst.msk [vmem:[#allocation2 + $0x48] sm:$0xff] %vm159_vm0, %v701_v0 }
  0x38   : > { %170 = vst.msk [vmem:[#allocation2 + $0x50] sm:$0xff] %vm159_vm0, %v701_v0  ;;  %171 = vst.msk [vmem:[#allocation2 + $0x58] sm:$0xff] %vm159_vm0, %v701_v0 }
  0x39   : > { %172 = vst.msk [vmem:[#allocation2 + $0x60] sm:$0xff] %vm159_vm0, %v701_v0  ;;  %173 = vst.msk [vmem:[#allocation2 + $0x68] sm:$0xff] %vm159_vm0, %v701_v0 }
  0x3a   : > { %174 = vst.msk [vmem:[#allocation2 + $0x70] sm:$0xff] %vm159_vm0, %v701_v0  ;;  %175 = vst.msk [vmem:[#allocation2 + $0x78] sm:$0xff] %vm159_vm0, %v701_v0 }
  0x3b PF: > { %v487_v1 = vld [vmem:[%s802_s28 + $0x8] sm:$0xff]   ;;  %v456_v2 = vld [vmem:[%s802_s28] sm:$0xff]   ;;  %v488_v7 = vld [vmem:[%s802_s28 + $0x10] sm:$0xff]   ;;  %vm272_vm1 = vcmask 7168   ;;  %p451_p7 = scmp.ne.s32.totalorder %s679_s9, 1 }
  0x3c   : > { %v461_v3 = vunpack.c.l.bf16 %v487_v1  ;;  %v457_v4 = vunpack.c.l.bf16 %v456_v2  ;;  %v462_v5 = vunpack.c.h.bf16 %v487_v1  ;;  %v458_v6 = vunpack.c.h.bf16 %v456_v2  ;;  %v489_v10 = vld [vmem:[%s802_s28 + $0x18] sm:$0xff]   ;;  %v490_v13 = vld [vmem:[%s802_s28 + $0x20] sm:$0xff]   ;;  %v491_v16 = vld [vmem:[%s802_s28 + $0x28] sm:$0xff]  }
  0x3d   : > { %v466_v8 = vunpack.c.h.bf16 %v488_v7  ;;  %v465_v9 = vunpack.c.l.bf16 %v488_v7  ;;  %v470_v11 = vunpack.c.h.bf16 %v489_v10  ;;  %v469_v12 = vunpack.c.l.bf16 %v489_v10  ;;  %v492_v19 = vld [vmem:[%s802_s28 + $0x30] sm:$0xff]   ;;  %v493_v22 = vld [vmem:[%s802_s28 + $0x38] sm:$0xff]   ;;  %v176_v26 = vld [vmem:[#allocation2] sm:$0xff] }
  0x3e   : > { %228 = vadd.xlane.f32.xlu1 %v461_v3  ;;  %224 = vadd.xlane.f32.xlu0 %v457_v4  ;;  %v474_v14 = vunpack.c.h.bf16 %v490_v13  ;;  %v473_v15 = vunpack.c.l.bf16 %v490_v13  ;;  %v478_v17 = vunpack.c.h.bf16 %v491_v16  ;;  %v477_v18 = vunpack.c.l.bf16 %v491_v16  ;;  %v178_v25 = vld [vmem:[#allocation2 + $0x10] sm:$0xff]  ;;  %v179_v31 = vld [vmem:[#allocation2 + $0x18] sm:$0xff]  ;;  %v177_v32 = vld [vmem:[#allocation2 + $0x8] sm:$0xff] }
  0x3f   : > { %v482_v20 = vunpack.c.h.bf16 %v492_v19  ;;  %v481_v21 = vunpack.c.l.bf16 %v492_v19  ;;  %v486_v23 = vunpack.c.h.bf16 %v493_v22  ;;  %v485_v24 = vunpack.c.l.bf16 %v493_v22  ;;  %v181_v37 = vld [vmem:[#allocation2 + $0x28] sm:$0xff]  ;;  %v180_v38 = vld [vmem:[#allocation2 + $0x20] sm:$0xff]  ;;  %v183_v43 = vld [vmem:[#allocation2 + $0x38] sm:$0xff] }
  0x40   : > { %v182_v44 = vld [vmem:[#allocation2 + $0x30] sm:$0xff]  ;;  %v185_v49 = vld [vmem:[#allocation2 + $0x48] sm:$0xff]  ;;  %v184_v50 = vld [vmem:[#allocation2 + $0x40] sm:$0xff] }
  0x41   : > { %v187_v55 = vld [vmem:[#allocation2 + $0x58] sm:$0xff]  ;;  %v186_v56 = vld [vmem:[#allocation2 + $0x50] sm:$0xff]  ;;  %v189_v61 = vld [vmem:[#allocation2 + $0x68] sm:$0xff] }
  0x42   : > { %230 = vadd.xlane.f32.xlu1 %v462_v5  ;;  %226 = vadd.xlane.f32.xlu0 %v458_v6  ;;  %v188_v62 = vld [vmem:[#allocation2 + $0x60] sm:$0xff]  ;;  %v191_v3 = vld [vmem:[#allocation2 + $0x78] sm:$0xff]  ;;  %v190_v4 = vld [vmem:[#allocation2 + $0x70] sm:$0xff] }
  0x46   : > { %234 = vadd.xlane.f32.xlu1 %v466_v8  ;;  %232 = vadd.xlane.f32.xlu0 %v465_v9 }
  0x4a   : > { %238 = vadd.xlane.f32.xlu1 %v470_v11  ;;  %236 = vadd.xlane.f32.xlu0 %v469_v12 }
  0x4e   : > { %242 = vadd.xlane.f32.xlu1 %v474_v14  ;;  %240 = vadd.xlane.f32.xlu0 %v473_v15 }
  0x52   : > { %246 = vadd.xlane.f32.xlu1 %v478_v17  ;;  %244 = vadd.xlane.f32.xlu0 %v477_v18 }
  0x56   : > { %250 = vadd.xlane.f32.xlu1 %v482_v20  ;;  %248 = vadd.xlane.f32.xlu0 %v481_v21 }
  0x5a   : > { %254 = vadd.xlane.f32.xlu1 %v486_v23  ;;  %252 = vadd.xlane.f32.xlu0 %v485_v24 }
  0xc7   : > { %v229_v27 = vpop.xlane.xlu1 %228  ;;  %v225_v28 = vpop.xlane.xlu0 %224 }
  0xc8   : > { %v258_v29 = vadd.f32 %v229_v27, %v178_v25  ;;  %v256_v30 = vadd.f32 %v225_v28, %v176_v26 }
  0xca   : > { %275 = vst.msk [vmem:[#allocation2 + $0x10] sm:$0xff] %vm272_vm1, %v258_v29  ;;  %273 = vst.msk [vmem:[#allocation2] sm:$0xff] %vm272_vm1, %v256_v30 }
  0xcb   : > { %v231_v33 = vpop.xlane.xlu1 %230  ;;  %v227_v34 = vpop.xlane.xlu0 %226 }
  0xcc   : > { %v259_v35 = vadd.f32 %v231_v33, %v179_v31  ;;  %v257_v36 = vadd.f32 %v227_v34, %v177_v32 }
  0xce   : > { %276 = vst.msk [vmem:[#allocation2 + $0x18] sm:$0xff] %vm272_vm1, %v259_v35  ;;  %274 = vst.msk [vmem:[#allocation2 + $0x8] sm:$0xff] %vm272_vm1, %v257_v36 }
  0xcf   : > { %v235_v39 = vpop.xlane.xlu1 %234  ;;  %v233_v40 = vpop.xlane.xlu0 %232 }
  0xd0   : > { %v261_v41 = vadd.f32 %v235_v39, %v181_v37  ;;  %v260_v42 = vadd.f32 %v233_v40, %v180_v38 }
  0xd2   : > { %278 = vst.msk [vmem:[#allocation2 + $0x28] sm:$0xff] %vm272_vm1, %v261_v41  ;;  %277 = vst.msk [vmem:[#allocation2 + $0x20] sm:$0xff] %vm272_vm1, %v260_v42 }
  0xd3   : > { %v239_v45 = vpop.xlane.xlu1 %238  ;;  %v237_v46 = vpop.xlane.xlu0 %236 }
  0xd4   : > { %v263_v47 = vadd.f32 %v239_v45, %v183_v43  ;;  %v262_v48 = vadd.f32 %v237_v46, %v182_v44 }
  0xd6   : > { %280 = vst.msk [vmem:[#allocation2 + $0x38] sm:$0xff] %vm272_vm1, %v263_v47  ;;  %279 = vst.msk [vmem:[#allocation2 + $0x30] sm:$0xff] %vm272_vm1, %v262_v48 }
  0xd7   : > { %v243_v51 = vpop.xlane.xlu1 %242  ;;  %v241_v52 = vpop.xlane.xlu0 %240 }
  0xd8   : > { %v265_v53 = vadd.f32 %v243_v51, %v185_v49  ;;  %v264_v54 = vadd.f32 %v241_v52, %v184_v50 }
  0xda   : > { %282 = vst.msk [vmem:[#allocation2 + $0x48] sm:$0xff] %vm272_vm1, %v265_v53  ;;  %281 = vst.msk [vmem:[#allocation2 + $0x40] sm:$0xff] %vm272_vm1, %v264_v54 }
  0xdb   : > { %v247_v57 = vpop.xlane.xlu1 %246  ;;  %v245_v58 = vpop.xlane.xlu0 %244 }
  0xdc   : > { %v267_v59 = vadd.f32 %v247_v57, %v187_v55  ;;  %v266_v60 = vadd.f32 %v245_v58, %v186_v56 }
  0xde   : > { %284 = vst.msk [vmem:[#allocation2 + $0x58] sm:$0xff] %vm272_vm1, %v267_v59  ;;  %283 = vst.msk [vmem:[#allocation2 + $0x50] sm:$0xff] %vm272_vm1, %v266_v60 }
  0xdf   : > { %v251_v63 = vpop.xlane.xlu1 %250  ;;  %v249_v0 = vpop.xlane.xlu0 %248 }
  0xe0   : > { %v269_v1 = vadd.f32 %v251_v63, %v189_v61  ;;  %v268_v2 = vadd.f32 %v249_v0, %v188_v62 }
  0xe2   : > { %286 = vst.msk [vmem:[#allocation2 + $0x68] sm:$0xff] %vm272_vm1, %v269_v1  ;;  %285 = vst.msk [vmem:[#allocation2 + $0x60] sm:$0xff] %vm272_vm1, %v268_v2  ;;  %292 = sbr.rel (%p451_p7) target bundleno = 264 (0x108), region = 36 }
  0xe3   : > { %v255_v5 = vpop.xlane.xlu1 %254  ;;  %v253_v6 = vpop.xlane.xlu0 %252 }
  0xe4   : > { %v271_v7 = vadd.f32 %v255_v5, %v191_v3  ;;  %v270_v8 = vadd.f32 %v253_v6, %v190_v4 }
  0xe6   : > { %288 = vst.msk [vmem:[#allocation2 + $0x78] sm:$0xff] %vm272_vm1, %v271_v7  ;;  %287 = vst.msk [vmem:[#allocation2 + $0x70] sm:$0xff] %vm272_vm1, %v270_v8 }
  0xe7   : > { %v293_v9 = vld [vmem:[#allocation2] sm:$0xff]  ;;  %v294_v10 = vld [vmem:[#allocation2 + $0x8] sm:$0xff]  ;;  %v295_v11 = vld [vmem:[#allocation2 + $0x10] sm:$0xff] }
  0xe8   : > { %v309_v12 = vadd.f32 1.0, %v293_v9  ;;  %v310_v13 = vadd.f32 1.0, %v294_v10  ;;  %v311_v14 = vadd.f32 1.0, %v295_v11  ;;  %v296_v15 = vld [vmem:[#allocation2 + $0x18] sm:$0xff]  ;;  %v297_v16 = vld [vmem:[#allocation2 + $0x20] sm:$0xff]  ;;  %v298_v17 = vld [vmem:[#allocation2 + $0x28] sm:$0xff] }
  0xe9   : > { %v312_v18 = vadd.f32 1.0, %v296_v15  ;;  %v299_v19 = vld [vmem:[#allocation2 + $0x30] sm:$0xff]  ;;  %v313_v20 = vadd.f32 1.0, %v297_v16  ;;  %v300_v21 = vld [vmem:[#allocation2 + $0x38] sm:$0xff]  ;;  %v314_v22 = vadd.f32 1.0, %v298_v17  ;;  %v301_v23 = vld [vmem:[#allocation2 + $0x40] sm:$0xff] }
  0xea   : > { %569 = vrsqrt.f32 %v309_v12  ;;  %v315_v24 = vadd.f32 1.0, %v299_v19  ;;  %v302_v25 = vld [vmem:[#allocation2 + $0x48] sm:$0xff]  ;;  %v316_v26 = vadd.f32 1.0, %v300_v21  ;;  %v303_v27 = vld [vmem:[#allocation2 + $0x50] sm:$0xff]  ;;  %v317_v28 = vadd.f32 1.0, %v301_v23  ;;  %v304_v29 = vld [vmem:[#allocation2 + $0x58] sm:$0xff] }
  0xeb   : > { %571 = vrsqrt.f32 %v310_v13  ;;  %v318_v30 = vadd.f32 1.0, %v302_v25  ;;  %v305_v31 = vld [vmem:[#allocation2 + $0x60] sm:$0xff]  ;;  %v319_v32 = vadd.f32 1.0, %v303_v27  ;;  %v306_v33 = vld [vmem:[#allocation2 + $0x68] sm:$0xff]  ;;  %v320_v34 = vadd.f32 1.0, %v304_v29 }
  0xec   : > { %573 = vrsqrt.f32 %v311_v14  ;;  %v321_v36 = vadd.f32 1.0, %v305_v31  ;;  %v322_v38 = vadd.f32 1.0, %v306_v33 }
  0xed   : > { %575 = vrsqrt.f32 %v312_v18  ;;  %v307_v35 = vld [vmem:[#allocation2 + $0x70] sm:$0xff]  ;;  %v308_v37 = vld [vmem:[#allocation2 + $0x78] sm:$0xff] }
  0xee   : > { %577 = vrsqrt.f32 %v313_v20  ;;  %v323_v39 = vadd.f32 1.0, %v307_v35  ;;  %v324_v40 = vadd.f32 1.0, %v308_v37 }
  0xef   : > { %579 = vrsqrt.f32 %v314_v22 }
  0xf0   : > { %581 = vrsqrt.f32 %v315_v24 }
  0xf1   : > { %583 = vrsqrt.f32 %v316_v26 }
  0xf2   : > { %585 = vrsqrt.f32 %v317_v28 }
  0xf3   : > { %587 = vrsqrt.f32 %v318_v30 }
  0xf4   : > { %589 = vrsqrt.f32 %v319_v32 }
  0xf5   : > { %591 = vrsqrt.f32 %v320_v34 }
  0xf6   : > { %593 = vrsqrt.f32 %v321_v36 }
  0xf7   : > { %v570_v41 = vpop.eup %569  ;;  %595 = vrsqrt.f32 %v322_v38 }
  0xf8   : > { %v572_v42 = vpop.eup %571  ;;  %341 = vst.msk [vmem:[%s812_s4] sm:$0xff] %vm272_vm1, %v570_v41  ;;  %597 = vrsqrt.f32 %v323_v39 }
  0xf9   : > { %v574_v43 = vpop.eup %573  ;;  %342 = vst.msk [vmem:[%s812_s4 + $0x8] sm:$0xff] %vm272_vm1, %v572_v42  ;;  %599 = vrsqrt.f32 %v324_v40 }
  0xfa   : > { %v576_v44 = vpop.eup %575  ;;  %343 = vst.msk [vmem:[%s812_s4 + $0x10] sm:$0xff] %vm272_vm1, %v574_v43 }
  0xfb   : > { %v578_v45 = vpop.eup %577  ;;  %344 = vst.msk [vmem:[%s812_s4 + $0x18] sm:$0xff] %vm272_vm1, %v576_v44 }
  0xfc   : > { %v580_v46 = vpop.eup %579  ;;  %345 = vst.msk [vmem:[%s812_s4 + $0x20] sm:$0xff] %vm272_vm1, %v578_v45 }
  0xfd   : > { %v582_v47 = vpop.eup %581  ;;  %346 = vst.msk [vmem:[%s812_s4 + $0x28] sm:$0xff] %vm272_vm1, %v580_v46 }
  0xfe   : > { %v584_v48 = vpop.eup %583  ;;  %347 = vst.msk [vmem:[%s812_s4 + $0x30] sm:$0xff] %vm272_vm1, %v582_v47 }
  0xff   : > { %v586_v49 = vpop.eup %585  ;;  %348 = vst.msk [vmem:[%s812_s4 + $0x38] sm:$0xff] %vm272_vm1, %v584_v48 }
 0x100   : > { %v588_v50 = vpop.eup %587  ;;  %349 = vst.msk [vmem:[%s812_s4 + $0x40] sm:$0xff] %vm272_vm1, %v586_v49 }
 0x101   : > { %v590_v51 = vpop.eup %589  ;;  %350 = vst.msk [vmem:[%s812_s4 + $0x48] sm:$0xff] %vm272_vm1, %v588_v50 }
 0x102   : > { %v592_v52 = vpop.eup %591  ;;  %351 = vst.msk [vmem:[%s812_s4 + $0x50] sm:$0xff] %vm272_vm1, %v590_v51 }
 0x103   : > { %v594_v53 = vpop.eup %593  ;;  %352 = vst.msk [vmem:[%s812_s4 + $0x58] sm:$0xff] %vm272_vm1, %v592_v52 }
 0x104   : > { %v596_v54 = vpop.eup %595  ;;  %353 = vst.msk [vmem:[%s812_s4 + $0x60] sm:$0xff] %vm272_vm1, %v594_v53 }
 0x105   : > { %v598_v55 = vpop.eup %597  ;;  %354 = vst.msk [vmem:[%s812_s4 + $0x68] sm:$0xff] %vm272_vm1, %v596_v54 }
 0x106   : > { %v600_v56 = vpop.eup %599  ;;  %355 = vst.msk [vmem:[%s812_s4 + $0x70] sm:$0xff] %vm272_vm1, %v598_v55 }
 0x107   : > { %356 = vst.msk [vmem:[%s812_s4 + $0x78] sm:$0xff] %vm272_vm1, %v600_v56 }
 0x108 PF: > { %s14_s13 = sadd.s32 1, %s695_s13   ;;  %s917_s6 = smov %s671_s7 }
 0x109   : > { %p11_p11 = scmp.ge.s32.totalorder %s14_s13, 6   ;;  %s918_s7 = smov %s675_s8 }
 0x10a   : > { %s919_s8 = smov %s779_s26  ;;  %s920_s9 = smov %s687_s11 }
 0x10b   : > { %s921_s10 = smov %s691_s12  ;;  %s922_s11 = smov %s925_s15 }
 0x10c   : > { %s923_s12 = smov %s929_s16  ;;  %13 = sbr.rel (!%p11_p11) target bundleno = 5 (0x5), region = 72 }
 0x111   :  { %379 = vsyncpa [#allocation4], 1 }
 0x112   :  { %381 = vsyncpa [#allocation4 + $0x1], 1 }

</bundles_post_ra>
